<compile_context>
chip_gen: v6e
topology: v6e:2x2x1
jax: 0.10.0
libtpu: 0.0.40
codegen_flags: <defaults>
</compile_context>

<pallas_src>
import functools
import math

import jax
import jax.numpy as jnp
from jax.experimental import pallas as pl
from jax.experimental.pallas import tpu as pltpu


def _attention_kernel(x_ref, w_ref, b_ref, o_ref, *, B, S, H, scale, mxu_dtype):
    # x: (B*S, H) in the input dtype; w: (H, 3H) mxu_dtype; b: (1, 3H) f32.
    x = x_ref[...].astype(mxu_dtype)                         # cast in-kernel, not in the wrapper

    # Fused Q/K/V projection: one MXU matmul, f32 accumulation, f32 bias add.
    qkv = jnp.dot(x, w_ref[...],
                  preferred_element_type=jnp.float32) + b_ref[...]      # (B*S, 3H) f32

    # Static lane slices of the fused projection.  The 1/sqrt(H) attention
    # scale is applied to q in f32 (exact, negligible cost).  The leading-dim
    # split (B*S, H) -> (B, S, H) is layout-trivial (8-row sublane tiles).
    q = (qkv[:, :H] * scale).reshape(B, S, H)
    k = qkv[:, H:2 * H].reshape(B, S, H)
    v = qkv[:, 2 * H:].reshape(B, S, H)

    # scores = q @ k^T per batch as a "contract last dims" batched matmul.
    scores = jnp.einsum("bqd,bkd->bqk",
                        q.astype(mxu_dtype), k.astype(mxu_dtype),
                        preferred_element_type=jnp.float32)             # (B, S, S) f32

    # Numerically-stable softmax; stats stay in f32.
    m = jnp.max(scores, axis=-1, keepdims=True)
    e = jnp.exp(scores - m)
    denom = jnp.sum(e, axis=-1, keepdims=True)                          # (B, S, 1)
    probs = e / denom                                                   # exact; no Newton step

    # attention_output = probs @ v (narrow MXU operands, f32 accumulation).
    out = jnp.einsum("bqk,bkd->bqd",
                     probs.astype(mxu_dtype), v.astype(mxu_dtype),
                     preferred_element_type=jnp.float32)                # (B, S, H)
    o_ref[...] = out.reshape(B * S, H).astype(o_ref.dtype)


def prepare_qkv_params(wq, bq, wk, bk, wv, bv, *, mxu_dtype=jnp.bfloat16):
    """One-time host prep: nn.Linear (out,in) weights -> fused x@W tile (H, 3H)."""
    w_fused = jnp.concatenate([wq.T, wk.T, wv.T], axis=1).astype(mxu_dtype)     # (H, 3H)
    b_fused = jnp.concatenate([bq, bk, bv]).reshape(1, -1).astype(jnp.float32)  # (1, 3H)
    return w_fused, b_fused


def self_attention_fused(feature, w_fused, b_fused, *, mxu_dtype=jnp.bfloat16):
    """feature: (B, S, H). w_fused: (H, 3H). b_fused: (1, 3H)."""
    B, S, H = feature.shape
    out_dtype = feature.dtype
    scale = 1.0 / math.sqrt(H)

    x2d = feature.reshape(B * S, H)   # contiguous -> free metadata-only reshape

    kernel = functools.partial(_attention_kernel, B=B, S=S, H=H, scale=scale,
                               mxu_dtype=mxu_dtype)

    out2d = pl.pallas_call(
        kernel,
        out_shape=jax.ShapeDtypeStruct((B * S, H), out_dtype),
        grid_spec=pl.GridSpec(
            grid=(1,),                # one step: whole problem in one invocation
            in_specs=[
                pl.BlockSpec((B * S, H), lambda i: (0, 0)),   # activations
                pl.BlockSpec((H, 3 * H), lambda i: (0, 0)),   # fused QKV weights
                pl.BlockSpec((1, 3 * H), lambda i: (0, 0)),   # fused biases (f32)
            ],
            out_specs=pl.BlockSpec((B * S, H), lambda i: (0, 0)),
        ),
        compiler_params=pltpu.CompilerParams(
            dimension_semantics=("arbitrary",)),
    )(x2d, w_fused, b_fused)
    return out2d.reshape(B, S, H)


def self_attention(feature, wq, bq, wk, bk, wv, bv, *, mxu_dtype=jnp.bfloat16):
    """Convenience wrapper; prefer prepare_qkv_params() once + self_attention_fused()."""
    w_fused, b_fused = prepare_qkv_params(wq, bq, wk, bk, wv, bv, mxu_dtype=mxu_dtype)
    return self_attention_fused(feature, w_fused, b_fused, mxu_dtype=mxu_dtype)


def self_attention_ref(feature, wq, bq, wk, bk, wv, bv):
    """Pure-JAX reference mirroring the PyTorch module."""
    q = feature @ wq.T + bq
    k = feature @ wk.T + bk
    v = feature @ wv.T + bv
    scores = jnp.einsum("bqh,bkh->bqk", q, k) / math.sqrt(feature.shape[-1])
    probs = jax.nn.softmax(scores, axis=-1)
    return jnp.einsum("bqk,bkh->bqh", probs, v)


if __name__ == "__main__":
    B, S, H = 2, 8, 32
    key = jax.random.PRNGKey(0)
    kx, kwq, kbq, kwk, kbk, kwv, kbv = jax.random.split(key, 7)

    feature = jax.random.normal(kx, (B, S, H), dtype=jnp.float32)

    # Deterministic parameter init (same shapes as nn.Linear(H, H)).
    bound = 1.0 / math.sqrt(H)
    wq = jax.random.uniform(kwq, (H, H), jnp.float32, -bound, bound)
    bq = jax.random.uniform(kbq, (H,), jnp.float32, -bound, bound)
    wk = jax.random.uniform(kwk, (H, H), jnp.float32, -bound, bound)
    bk = jax.random.uniform(kbk, (H,), jnp.float32, -bound, bound)
    wv = jax.random.uniform(kwv, (H, H), jnp.float32, -bound, bound)
    bv = jax.random.uniform(kbv, (H,), jnp.float32, -bound, bound)

    ref = self_attention_ref(feature, wq, bq, wk, bk, wv, bv)

    # Default bf16-MXU path (bf16 operands, f32 accumulation + f32 softmax
    # stats) — the right trade on v5e/v6e/v7x.  Weight prep done once, reused.
    w_bf16, b_f32 = prepare_qkv_params(wq, bq, wk, bk, wv, bv, mxu_dtype=jnp.bfloat16)
    fwd = jax.jit(functools.partial(self_attention_fused, mxu_dtype=jnp.bfloat16))
    out = jax.block_until_ready(fwd(feature, w_bf16, b_f32))
    assert out.shape == (B, S, H)
    assert jnp.allclose(out, ref, atol=5e-2, rtol=5e-2), "bf16 path mismatch vs reference"

    # Exact f32-MXU path (same kernel, f32 operands everywhere).
    out_f32 = jax.block_until_ready(
        self_attention(feature, wq, bq, wk, bk, wv, bv, mxu_dtype=jnp.float32))
    assert jnp.allclose(out_f32, ref, atol=1e-4, rtol=1e-4), "f32 path mismatch vs reference"

    print("KERNEL_OK")
</pallas_src>

<mosaic_0001>
module attributes {stable_mosaic.version = 11 : i64} {
  func.func @_attention_kernel(%arg0: i32, %arg1: memref<16x32xf32, #tpu.memory_space<vmem>>, %arg2: memref<32x96xbf16, #tpu.memory_space<vmem>>, %arg3: memref<1x96xf32, #tpu.memory_space<vmem>>, %arg4: memref<16x32xf32, #tpu.memory_space<vmem>>) attributes {dimension_semantics = [#tpu.dimension_semantics<arbitrary>], iteration_bounds = array<i64: 1>, scalar_prefetch = 0 : i64, scratch_operands = 0 : i64, tpu.core_type = #tpu.core_type<tc>, window_params = [{pipeline_mode = #tpu.pipeline_mode<synchronous>, transform_indices = @transform_0, window_bounds = array<i64: 16, 32>}, {pipeline_mode = #tpu.pipeline_mode<synchronous>, transform_indices = @transform_1, window_bounds = array<i64: 32, 96>}, {pipeline_mode = #tpu.pipeline_mode<synchronous>, transform_indices = @transform_2, window_bounds = array<i64: 1, 96>}, {pipeline_mode = #tpu.pipeline_mode<synchronous>, transform_indices = @transform_3, window_bounds = array<i64: 16, 32>}]} {
    %c0 = arith.constant 0 : index
    %c0_0 = arith.constant 0 : index
    %0 = vector.load %arg1[%c0, %c0_0] : memref<16x32xf32, #tpu.memory_space<vmem>>, vector<16x32xf32>
    %1 = arith.truncf %0 : vector<16x32xf32> to vector<16x32xbf16>
    %c0_1 = arith.constant 0 : index
    %c0_2 = arith.constant 0 : index
    %2 = vector.load %arg2[%c0_1, %c0_2] : memref<32x96xbf16, #tpu.memory_space<vmem>>, vector<32x96xbf16>
    %cst = arith.constant dense<0.000000e+00> : vector<16x96xf32>
    %3 = tpu.matmul %1, %2, %cst {dimension_numbers = #tpu.dot_dimension_numbers<[1], [0], [0], [1], [0, 0, 1, 1], [], []>} : vector<16x32xbf16>, vector<32x96xbf16>, vector<16x96xf32> -> vector<16x96xf32>
    %c0_3 = arith.constant 0 : index
    %c0_4 = arith.constant 0 : index
    %4 = vector.load %arg3[%c0_3, %c0_4] : memref<1x96xf32, #tpu.memory_space<vmem>>, vector<1x96xf32>
    %5 = vector.broadcast %4 : vector<1x96xf32> to vector<16x96xf32>
    %6 = arith.addf %3, %5 : vector<16x96xf32>
    %7 = vector.extract_strided_slice %6 {offsets = [0, 0], sizes = [16, 32], strides = [1, 1]} : vector<16x96xf32> to vector<16x32xf32>
    %cst_5 = arith.constant 0.176776692 : f32
    %8 = vector.broadcast %cst_5 : f32 to vector<16x32xf32>
    %9 = arith.mulf %7, %8 : vector<16x32xf32>
    %10 = vector.shape_cast %9 : vector<16x32xf32> to vector<2x8x32xf32>
    %11 = vector.extract_strided_slice %6 {offsets = [0, 32], sizes = [16, 32], strides = [1, 1]} : vector<16x96xf32> to vector<16x32xf32>
    %12 = vector.shape_cast %11 : vector<16x32xf32> to vector<2x8x32xf32>
    %13 = vector.extract_strided_slice %6 {offsets = [0, 64], sizes = [16, 32], strides = [1, 1]} : vector<16x96xf32> to vector<16x32xf32>
    %14 = vector.shape_cast %13 : vector<16x32xf32> to vector<2x8x32xf32>
    %15 = arith.truncf %10 : vector<2x8x32xf32> to vector<2x8x32xbf16>
    %16 = arith.truncf %12 : vector<2x8x32xf32> to vector<2x8x32xbf16>
    "tpu.trace_start"() <{level = 10 : i32, message = "bqd,bkd->bqk"}> : () -> ()
    %cst_6 = arith.constant dense<0.000000e+00> : vector<2x8x8xf32>
    %17 = tpu.matmul %15, %16, %cst_6 {dimension_numbers = #tpu.dot_dimension_numbers<[2], [2], [1], [1], [0, 0, 0, 1, 1, 1], [0], [0]>} : vector<2x8x32xbf16>, vector<2x8x32xbf16>, vector<2x8x8xf32> -> vector<2x8x8xf32>
    "tpu.trace_stop"() : () -> ()
    %cst_7 = arith.constant dense<0xFF800000> : vector<2x8xf32>
    %18 = vector.multi_reduction <maximumf>, %17, %cst_7 [2] : vector<2x8x8xf32> to vector<2x8xf32>
    %19 = vector.shape_cast %18 : vector<2x8xf32> to vector<2x8x1xf32>
    %20 = vector.broadcast %19 : vector<2x8x1xf32> to vector<2x8x8xf32>
    %21 = arith.subf %17, %20 : vector<2x8x8xf32>
    %22 = math.exp %21 : vector<2x8x8xf32>
    %cst_8 = arith.constant dense<0.000000e+00> : vector<2x8xf32>
    %23 = vector.multi_reduction <add>, %22, %cst_8 [2] : vector<2x8x8xf32> to vector<2x8xf32>
    %24 = vector.shape_cast %23 : vector<2x8xf32> to vector<2x8x1xf32>
    %25 = vector.broadcast %24 : vector<2x8x1xf32> to vector<2x8x8xf32>
    %26 = arith.divf %22, %25 : vector<2x8x8xf32>
    %27 = arith.truncf %26 : vector<2x8x8xf32> to vector<2x8x8xbf16>
    %28 = arith.truncf %14 : vector<2x8x32xf32> to vector<2x8x32xbf16>
    "tpu.trace_start"() <{level = 10 : i32, message = "bqk,bkd->bqd"}> : () -> ()
    %cst_9 = arith.constant dense<0.000000e+00> : vector<2x8x32xf32>
    %29 = tpu.matmul %27, %28, %cst_9 {dimension_numbers = #tpu.dot_dimension_numbers<[2], [1], [1], [2], [0, 0, 0, 1, 1, 2], [0], [0]>} : vector<2x8x8xbf16>, vector<2x8x32xbf16>, vector<2x8x32xf32> -> vector<2x8x32xf32>
    "tpu.trace_stop"() : () -> ()
    %30 = vector.shape_cast %29 : vector<2x8x32xf32> to vector<16x32xf32>
    %c0_10 = arith.constant 0 : index
    %c0_11 = arith.constant 0 : index
    %31 = vector.load %arg4[%c0_10, %c0_11] : memref<16x32xf32, #tpu.memory_space<vmem>>, vector<16x32xf32>
    tpu.vector_store %arg4[%c0_10, %c0_11], %30 {strides = array<i32>} : memref<16x32xf32, #tpu.memory_space<vmem>>, vector<16x32xf32>,
    return
  }
  func.func @transform_0(%arg0: i32) -> (i32, i32) {
    %c0_i32 = arith.constant 0 : i32
    %c0_i32_0 = arith.constant 0 : i32
    %c0_i32_1 = arith.constant 0 : i32
    return %c0_i32, %c0_i32_0 : i32, i32
  }
  func.func @transform_1(%arg0: i32) -> (i32, i32) {
    %c0_i32 = arith.constant 0 : i32
    %c0_i32_0 = arith.constant 0 : i32
    %c0_i32_1 = arith.constant 0 : i32
    return %c0_i32, %c0_i32_0 : i32, i32
  }
  func.func @transform_2(%arg0: i32) -> (i32, i32) {
    %c0_i32 = arith.constant 0 : i32
    %c0_i32_0 = arith.constant 0 : i32
    %c0_i32_1 = arith.constant 0 : i32
    return %c0_i32, %c0_i32_0 : i32, i32
  }
  func.func @transform_3(%arg0: i32) -> (i32, i32) {
    %c0_i32 = arith.constant 0 : i32
    %c0_i32_0 = arith.constant 0 : i32
    %c0_i32_1 = arith.constant 0 : i32
    return %c0_i32, %c0_i32_0 : i32, i32
  }
}

</mosaic_0001>

<bundles_post_ra>
// kernel: self_attention_fused.1
= control target key start
LH: loop header
LB: loop body
LE: loop exit
PB: predicated region body
PF: predicated region fallthrough
CT: control target
= control target key end

     0   :  { %8 = vsyncpa [#allocation3], 0  ;;  %s570_s0 = inlined_call_operand.hbm [shape: f32[16,32], index: 0, kind: input, shape index: {}]   ;;  %s571_s1 = inlined_call_operand.hbm [shape: bf16[32,96], index: 1, kind: input, shape index: {}]   ;;  %s572_s2 = inlined_call_operand.vmem [shape: f32[1,96], index: 2, kind: input, shape index: {}]   ;;  %s573_s3 = inlined_call_operand.hbm [shape: f32[16,32], index: 3, kind: output, shape index: {}]  }
   0x1   :  { %9 = vsyncpa [#allocation6], 0 }
   0x2   :  { %10 = vsyncpa [#allocation4], 0  ;;  %s498_s12 = smov [#allocation2]  }
   0x3   :  { %s16_s13 = sshll.u32 %s498_s12, 4  ;;  %s17_s13 = int_to_ptr.vmem [resolvable:$true] %s16_s13 }
   0x4   :  { %s440_s14 = scalar_lea.vmem %s17_s13, 256  ;;  %p445_p1 = scmp.lt.s32.totalorder %s17_s13, %s17_s13 }
   0x5   :  { %p441_p0 = scmp.ne.s32.totalorder %s17_s13, %s440_s14  ;;  %p446_p2 = scmp.lt.s32.totalorder %s440_s14, %s440_s14 }
   0x7   :  { %p447_p3 = por %p446_p2, %p445_p1 }
   0x9   :  { %p448_p4 = pnand %p447_p3, %p441_p0 }
   0xb   :  { %451 = shalt.err (!%p448_p4)
}
   0xc   :  { %s499_s15 = smov 128   ;;  %s500_s16 = smov 8  }
   0xd   :  { %22 = dma.hbm_to_vmem [thread:$0]  %s570_s0, 256, %s17_s13, [#allocation3], %s499_s15, %s499_s15, %s500_s16  }
   0xe   :  { %s501_s19 = smov [#allocation5]  }
   0xf   :  { %s28_s20 = sshll.u32 %s501_s19, 4  ;;  %s29_s20 = int_to_ptr.vmem [resolvable:$true] %s28_s20 }
  0x10   :  { %s460_s21 = scalar_lea.vmem %s29_s20, 256  ;;  %p465_p6 = scmp.lt.s32.totalorder %s29_s20, %s29_s20 }
  0x11   :  { %p461_p5 = scmp.ne.s32.totalorder %s29_s20, %s460_s21  ;;  %p466_p7 = scmp.lt.s32.totalorder %s460_s21, %s460_s21 }
  0x13   :  { %p467_p8 = por %p466_p7, %p465_p6 }
  0x15   :  { %p468_p9 = pnand %p467_p8, %p461_p5 }
  0x17   :  { %471 = shalt.err (!%p468_p9)
}
  0x18   :  { %s502_s22 = smov 64   ;;  %s503_s23 = smov 4  }
  0x19   :  { %34 = dma.hbm_to_vmem [thread:$0]  %s571_s1, 256, %s29_s20, [#allocation6], %s502_s22, %s502_s22, %s503_s23  }
  0x1a   :  { %492 = dma.done.wait [#allocation3], 256  }
  0x1b   :  { %493 = vsyncadd [#allocation3], 4294967040 }
  0x1c   :  { %494 = dma.done.wait [#allocation6], 256  }
  0x1d   :  { %495 = vsyncadd [#allocation6], 4294967040  ;;  %v504_v0 = vmov 0.0   ;;  %vm505_vm0 = vmmov 0   ;;  %v422_v1 = vld [vmem:[#allocation5 + $0x8] sm:$0xff]   ;;  %v423_v2 = vld [vmem:[#allocation5] sm:$0xff]  }
  0x1e   :  { %380 = vmatprep.subr.bf16.mxu0 %v504_v0  ;;  %384 = vmatprep.mubr.msk.bf16.mxu0 %vm505_vm0, %v504_v0  ;;  %v44_v3 = vld [vmem:[#allocation2] sm:$0xff]  ;;  %v45_v4 = vld [vmem:[#allocation2 + $0x8] sm:$0xff]  ;;  %vm70_vm1 = vcmask 261120   ;;  %s506_s26 = smov 96   ;;  %vm219_vm2 = vcmask 64512   ;;  %vm249_vm3 = vcmask 1043456  }
  0x1f   :  { %388 = vmatprep.subr.bf16.mxu1 %v504_v0  ;;  %390 = vmatprep.mubr.msk.bf16.mxu1 %vm505_vm0, %v504_v0  ;;  %v46_v5 = vpack.c.bf16 %v45_v4, %v44_v3  ;;  %v361_v6 = vld [vmem:[%s572_s2] ss:$0 sm:$0xff]  ;;  %s507_s2 = smov [#allocation7]  }
  0x20   :  { %381 = vmatpush3.bf16.msra.mxu0 %v422_v1  ;;  %s348_s27 = sshll.u32 %s507_s2, 4  ;;  %s349_s27 = int_to_ptr.vmem [resolvable:$true] %s348_s27 }
  0x21   :  { %382 = vmatprep.subr.bf16.mxu0 %v504_v0  ;;  %s472_s28 = scalar_lea.vmem %s349_s27, 256  ;;  %p477_p11 = scmp.lt.s32.totalorder %s349_s27, %s349_s27 }
  0x22   :  { %p473_p10 = scmp.ne.s32.totalorder %s349_s27, %s472_s28  ;;  %p478_p12 = scmp.lt.s32.totalorder %s472_s28, %s472_s28 }
  0x24   :  { %383 = vmatpush3.bf16.msra.mxu0 %v423_v2  ;;  %p479_p13 = por %p478_p12, %p477_p11 }
  0x25   :  { %394 = vmatprep.subr.bf16.mxu0 %v504_v0 }
  0x26   :  { %p480_p0 = pnand %p479_p13, %p473_p10 }
  0x27   :  { %385 = vmatmul.mubr.msk.bf16.vlgmr.msra.gmra.mxu0 %vm70_vm1, %v46_v5 }
  0x28   :  { %396 = vmatprep.mubr.msk.bf16.mxu0 %vm505_vm0, %v504_v0 }
  0xe7   :  { %v108_v7 = vpop.f32.mrf.mxu0 }
  0xe8   :  { %v109_v8 = vadd.f32 %v361_v6, %v108_v7 }
  0xe9   :  { %v386_v9 = vpop.f32.mrf.mxu0 }
  0xea   :  { %v119_v10 = vpack.c.bf16 %v109_v8, %v109_v8  ;;  %v115_v17 = vmul.f32 0.17677669, %v109_v8 }
  0xeb   :  { %v111_v11 = vpop.f32.mrf.mxu0 }
  0xec   :  { %v112_v12 = vadd.f32 %v361_v6, %v111_v11  ;;  %122 = vrot.lane.b32.xlu0 %v119_v10, %s506_s26  ;;  %v117_v20 = vpack.c.bf16 %v115_v17, %v115_v17 }
  0xed   :  { %v387_v13 = vpop.f32.mrf.mxu0 }
  0xee   :  { %v120_v14 = vpack.c.bf16 %v112_v12, %v112_v12  ;;  %v116_v21 = vmul.f32 0.17677669, %v112_v12 }
  0xf0   :  { %171 = vrot.lane.b32.xlu0 %v120_v14, %s506_s26  ;;  %v118_v22 = vpack.c.bf16 %v116_v21, %v116_v21 }
 0x15e   :  { %v123_v15 = vpop.permute.xlu0 %122 }
 0x15f   :  { %v128_v16 = vsel %vm70_vm1, %v123_v15, 0 }
 0x160   :  { %389 = vmatpush3.bf16.xpose.msra.mxu1 %v128_v16 }
 0x161   :  { %400 = vmatprep.subr.bf16.mxu1 %v504_v0 }
 0x162   :  { %v172_v18 = vpop.permute.xlu0 %171 }
 0x163   :  { %v177_v19 = vsel %vm70_vm1, %v172_v18, 0 }
 0x164   :  { %395 = vmatpush3.bf16.xpose.msra.mxu0 %v177_v19 }
 0x165   :  { %406 = vmatprep.subr.bf16.mxu0 %v504_v0 }
 0x167   :  { %391 = vmatmul.mubr.msk.bf16.vlgmr.msra.gmra.mxu1 %vm70_vm1, %v117_v20 }
 0x168   :  { %402 = vmatprep.mubr.msk.bf16.mxu1 %vm505_vm0, %v504_v0 }
 0x16b   :  { %397 = vmatmul.mubr.msk.bf16.vlgmr.msra.gmra.mxu0 %vm70_vm1, %v118_v22 }
 0x16c   :  { %408 = vmatprep.mubr.msk.bf16.mxu0 %vm505_vm0, %v504_v0 }
 0x227   :  { %v164_v23 = vpop.f32.mrf.mxu1 }
 0x228   :  { %v220_v24 = vsel %vm219_vm2, %v164_v23, -inf }
 0x229   :  { %221 = vmax.xlane.f32.xlu1 %v220_v24  ;;  %v392_v25 = vpop.f32.mrf.mxu1 }
 0x22b   :  { %v167_v26 = vpop.f32.mrf.mxu1  ;;  %v213_v27 = vpop.f32.mrf.mxu0 }
 0x22c   :  { %v223_v28 = vsel %vm219_vm2, %v213_v27, -inf }
 0x22d   :  { %v393_v29 = vpop.f32.mrf.mxu1  ;;  %224 = vmax.xlane.f32.xlu1 %v223_v28  ;;  %v398_v30 = vpop.f32.mrf.mxu0 }
 0x22f   :  { %v216_v31 = vpop.f32.mrf.mxu0 }
 0x231   :  { %v399_v32 = vpop.f32.mrf.mxu0 }
 0x23e   :  { %244 = vrot.lane.b32.xlu1 %v119_v10, %s502_s22 }
 0x2b2   :  { %v222_v33 = vpop.xlane.xlu1 %221 }
 0x2b3   :  { %v226_v34 = vsub.f32 %v164_v23, %v222_v33 }
 0x2b5   :  { %v228_v35 = vmul.f32 1.442695, %v226_v34 }
 0x2b6   :  { %v225_v36 = vpop.xlane.xlu1 %224 }
 0x2b7   :  { %424 = vpow2.f32 %v228_v35  ;;  %v227_v37 = vsub.f32 %v213_v27, %v225_v36 }
 0x2b9   :  { %v230_v38 = vmul.f32 1.442695, %v227_v37 }
 0x2ba   :  { %v245_v39 = vpop.permute.xlu1 %244 }
 0x2bb   :  { %426 = vpow2.f32 %v230_v38  ;;  %v251_v40 = vsel %vm249_vm3, %v245_v39, 0 }
 0x2bc   :  { %401 = vmatpush3.bf16.msra.mxu1 %v251_v40 }
 0x2c4   :  { %v425_v41 = vpop.eup %424 }
 0x2c5   :  { %v232_v42 = vsel %vm219_vm2, %v425_v41, 0.0 }
 0x2c6   :  { %233 = vadd.xlane.f32.xlu0 %v232_v42 }
 0x2c8   :  { %v427_v43 = vpop.eup %426 }
 0x2c9   :  { %v235_v44 = vsel %vm219_vm2, %v427_v43, 0.0 }
 0x2ca   :  { %236 = vadd.xlane.f32.xlu1 %v235_v44 }
 0x2db   :  { %293 = vrot.lane.b32.xlu1 %v120_v14, %s502_s22 }
 0x34f   :  { %v234_v45 = vpop.xlane.xlu0 %233 }
 0x350   :  { %428 = vrcp.f32 %v234_v45 }
 0x353   :  { %v237_v46 = vpop.xlane.xlu1 %236 }
 0x354   :  { %430 = vrcp.f32 %v237_v46 }
 0x357   :  { %v294_v47 = vpop.permute.xlu1 %293 }
 0x358   :  { %v299_v48 = vsel %vm249_vm3, %v294_v47, 0 }
 0x359   :  { %407 = vmatpush3.bf16.msra.mxu0 %v299_v48 }
 0x35d   :  { %v429_v49 = vpop.eup %428 }
 0x35e   :  { %v239_v50 = vmul.f32 %v429_v49, %v425_v41 }
 0x360   :  { %v242_v51 = vpack.c.bf16 %v239_v50, %v239_v50 }
 0x361   :  { %v431_v52 = vpop.eup %430 }
 0x362   :  { %403 = vmatmul.mubr.msk.bf16.vlgmr.msra.gmra.mxu1 %vm219_vm2, %v242_v51  ;;  %v241_v53 = vmul.f32 %v431_v52, %v427_v43 }
 0x364   :  { %v243_v54 = vpack.c.bf16 %v241_v53, %v241_v53 }
 0x366   :  { %409 = vmatmul.mubr.msk.bf16.vlgmr.msra.gmra.mxu0 %vm219_vm2, %v243_v54 }
 0x422   :  { %v287_v55 = vpop.f32.mrf.mxu1 }
 0x423   :  { %341 = vst.msk [vmem:[#allocation7] sm:$0xff] %vm70_vm1, %v287_v55 }
 0x424   :  { %v404_v56 = vpop.f32.mrf.mxu1 }
 0x426   :  { %v290_v57 = vpop.f32.mrf.mxu1  ;;  %v335_v58 = vpop.f32.mrf.mxu0 }
 0x427   :  { %342 = vst.msk [vmem:[#allocation7 + $0x8] sm:$0xff] %vm70_vm1, %v335_v58 }
 0x428   :  { %v405_v59 = vpop.f32.mrf.mxu1  ;;  %v410_v60 = vpop.f32.mrf.mxu0 }
 0x429   :  { %483 = shalt.err (!%p480_p0)
}
 0x42a   :  { %354 = dma.vmem_to_hbm [thread:$0]  %s349_s27, 256, %s573_s3, [#allocation4], %s499_s15, %s499_s15, %s500_s16   ;;  %v338_v61 = vpop.f32.mrf.mxu0 }
 0x42c   :  { %v411_v62 = vpop.f32.mrf.mxu0 }
 0x42d   :  { %496 = dma.done.wait [#allocation4], 256  }
 0x42e   :  { %497 = vsyncadd [#allocation4], 4294967040 }
 0x42f   :  { %358 = vsyncpa [#allocation3], 1 }
 0x430   :  { %359 = vsyncpa [#allocation6], 1 }
 0x431   :  { %360 = vsyncpa [#allocation4], 1 }

</bundles_post_ra>
